<compile_context>
chip_gen: v7x
topology: tpu7x:2x2x1
jax: 0.10.0
libtpu: 0.0.40
codegen_flags: <defaults>
</compile_context>

<pallas_src>
import jax
import jax.numpy as jnp
from jax.experimental import pallas as pl
from jax.experimental.pallas import tpu as pltpu

NUM_FREQUENCIES = 2
F = 2 * NUM_FREQUENCIES        # 4 input features
LANE = 128                     # samples packed per output lane row
K = F * LANE                   # 512 = contraction depth of the expanded matmul
MAX_TILE_ROWS = 1024           # rows of the (n_rows, 512) view per grid step
                               # -> 2 MiB x block (double buffered)


def _round_up(a, b):
    return (a + b - 1) // b * b


def _choose_tile_rows(n_rows):
    """Largest legal row tile, keeping >=2 parallel grid steps when possible."""
    if n_rows <= 8:
        return n_rows                        # full-extent block (always legal)
    tile = min(MAX_TILE_ROWS, (n_rows // 8) * 8)
    # v7x has 2 TensorCores: avoid a 1-step grid for mid-sized N so both TCs
    # stream from HBM.  Extra step costs ~0.35us on 1-TC chips -> negligible.
    if n_rows >= 16 and tile >= n_rows:
        tile = _round_up(pl.cdiv(n_rows, 2), 8)
    return tile


def linear_kernel(x_ref, w_ref, b_ref, o_ref):
    # x_ref: (tile_r, 512) VMEM  -- 128 samples/row, 4 features interleaved
    # w_ref: (512, 128)   VMEM  -- block-diagonal expansion of the (1,4) weight
    # b_ref: (1,)         SMEM  -- bias scalar
    # o_ref: (tile_r, 128) VMEM -- lane- and sublane-dense output block
    o_ref[...] = (
        jnp.dot(x_ref[...], w_ref[...], preferred_element_type=jnp.float32)
        + b_ref[0]
    ).astype(o_ref.dtype)


@jax.jit
def net_forward(x, w, b):
    """Pallas equivalent of Net.forward.

    x: (N, 4) f32, w: (1, 4) f32, b: (1, 1) f32  ->  (N,) f32
    """
    N, Fin = x.shape
    assert Fin == F

    # Free reshape of the row-major (N, 4) input to (n_rows, 512).  Padding
    # (a tiny copy) only happens for ragged N; for N % 128 == 0 there is zero
    # layout plumbing in HBM.
    n_pad = _round_up(N, LANE)
    x_p = x if n_pad == N else jnp.pad(x, ((0, n_pad - N), (0, 0)))
    n_rows = n_pad // LANE
    x_rows = x_p.reshape(n_rows, K).astype(jnp.float32)

    # Block-diagonal weight expansion: W_exp[4k+f, k] = w[f], zeros elsewhere.
    eye = jnp.eye(LANE, dtype=jnp.float32)                          # (128, 128)
    w_exp = (eye[:, None, :] * w.reshape(1, F, 1).astype(jnp.float32)
             ).reshape(K, LANE)                                     # (512, 128)
    b_flat = b.reshape(1).astype(jnp.float32)

    tile_r = _choose_tile_rows(n_rows)
    grid = pl.cdiv(n_rows, tile_r)      # ragged last block handled by masking

    out = pl.pallas_call(
        linear_kernel,
        out_shape=jax.ShapeDtypeStruct((n_rows, LANE), jnp.float32),
        grid_spec=pltpu.PrefetchScalarGridSpec(
            num_scalar_prefetch=0,
            grid=(grid,),
            in_specs=[
                pl.BlockSpec((tile_r, K), lambda i: (i, 0)),           # x rows
                pl.BlockSpec((K, LANE), lambda i: (0, 0)),             # weights (resident, fetched once)
                pl.BlockSpec(memory_space=pltpu.MemorySpace.SMEM),     # bias scalar
            ],
            out_specs=pl.BlockSpec((tile_r, LANE), lambda i: (i, 0)),
        ),
        compiler_params=pltpu.CompilerParams(
            dimension_semantics=("parallel",)),
        cost_estimate=pl.CostEstimate(
            flops=2 * n_pad * K,
            transcendentals=0,
            bytes_accessed=n_pad * F * 4 + n_pad * 4 + K * LANE * 4),
    )(x_rows, w_exp, b_flat)

    # (n_rows, 128) -> (n_pad,) is a free reshape.  Flatten()+squeeze() of the
    # reference module are pure shape glue.  The [:N] slice exists only for
    # ragged N.
    y = out.reshape(n_pad)
    return y if n_pad == N else y[:N]


def _reference(x, w, b):
    # Exact-f32 reference (elementwise multiply + reduce; no matmul precision
    # ambiguity on the reference side).
    return jnp.sum(x * w.reshape(1, F), axis=-1) + b.reshape(())


if __name__ == "__main__":
    key = jax.random.PRNGKey(0)
    k_x, k_w, k_b = jax.random.split(key, 3)

    # Mirrors the training setup: 2000 samples, 2*NUM_FREQUENCIES = 4 features.
    N = 2000
    x = jax.random.normal(k_x, (N, F), dtype=jnp.float32)

    # Deterministic params (mimics nn.Linear's uniform(-1/sqrt(F), 1/sqrt(F))).
    bound = 1.0 / jnp.sqrt(jnp.float32(F))
    w = jax.random.uniform(k_w, (1, F), dtype=jnp.float32, minval=-bound, maxval=bound)
    b = jax.random.uniform(k_b, (1, 1), dtype=jnp.float32, minval=-bound, maxval=bound)

    y = net_forward(x, w, b)
    jax.block_until_ready(y)
    assert y.shape == (N,)

    # MXU f32 matmuls are evaluated via multi-pass bf16 decomposition; allow a
    # small rounding headroom vs. the exact-f32 elementwise reference.
    y_ref = _reference(x, w, b)
    assert jnp.allclose(y, y_ref, atol=1e-4, rtol=1e-4)

    # Second check: N multiple of 128 (zero pad/slice path) with a ragged grid
    # (n_rows=11, tile_r=8 -> masked last block).
    N2 = 1408
    x2 = jax.random.normal(k_x, (N2, F), dtype=jnp.float32)
    y2 = net_forward(x2, w, b)
    jax.block_until_ready(y2)
    assert y2.shape == (N2,)
    assert jnp.allclose(y2, _reference(x2, w, b), atol=1e-4, rtol=1e-4)

    print("KERNEL_OK")
</pallas_src>

<mosaic_0001>
module attributes {stable_mosaic.version = 11 : i64} {
  func.func @linear_kernel(%arg0: i32, %arg1: memref<8x512xf32, #tpu.memory_space<vmem>>, %arg2: memref<512x128xf32, #tpu.memory_space<vmem>>, %arg3: memref<1xf32, #tpu.memory_space<smem>>, %arg4: memref<8x128xf32, #tpu.memory_space<vmem>>) attributes {dimension_semantics = [#tpu.dimension_semantics<parallel>], iteration_bounds = array<i64: 2>, scalar_prefetch = 0 : i64, scratch_operands = 0 : i64, tpu.core_type = #tpu.core_type<tc>, window_params = [{transform_indices = @transform_0, window_bounds = array<i64: 8, 512>}, {pipeline_mode = #tpu.pipeline_mode<synchronous>, transform_indices = @transform_1, window_bounds = array<i64: 512, 128>}, {transform_indices = @transform_2, window_bounds = array<i64: 1>}, {transform_indices = @transform_3, window_bounds = array<i64: 8, 128>}]} {
    %c0 = arith.constant 0 : index
    %c0_0 = arith.constant 0 : index
    %0 = vector.load %arg1[%c0, %c0_0] : memref<8x512xf32, #tpu.memory_space<vmem>>, vector<8x512xf32>
    %c0_1 = arith.constant 0 : index
    %c0_2 = arith.constant 0 : index
    %1 = vector.load %arg2[%c0_1, %c0_2] : memref<512x128xf32, #tpu.memory_space<vmem>>, vector<512x128xf32>
    %cst = arith.constant dense<0.000000e+00> : vector<8x128xf32>
    %2 = tpu.matmul %0, %1, %cst {dimension_numbers = #tpu.dot_dimension_numbers<[1], [0], [0], [1], [0, 0, 1, 1], [], []>} : vector<8x512xf32>, vector<512x128xf32>, vector<8x128xf32> -> vector<8x128xf32>
    %c0_3 = arith.constant 0 : index
    %3 = memref.load %arg3[%c0_3] : memref<1xf32, #tpu.memory_space<smem>>
    %4 = vector.broadcast %3 : f32 to vector<8x128xf32>
    %5 = arith.addf %2, %4 : vector<8x128xf32>
    %c0_4 = arith.constant 0 : index
    %c0_5 = arith.constant 0 : index
    %6 = vector.load %arg4[%c0_4, %c0_5] : memref<8x128xf32, #tpu.memory_space<vmem>>, vector<8x128xf32>
    tpu.vector_store %arg4[%c0_4, %c0_5], %5 {strides = array<i32>} : memref<8x128xf32, #tpu.memory_space<vmem>>, vector<8x128xf32>,
    return
  }
  func.func @transform_0(%arg0: i32) -> (i32, i32) {
    %c0_i32 = arith.constant 0 : i32
    %c0_i32_0 = arith.constant 0 : i32
    return %arg0, %c0_i32 : i32, i32
  }
  func.func @transform_1(%arg0: i32) -> (i32, i32) {
    %c0_i32 = arith.constant 0 : i32
    %c0_i32_0 = arith.constant 0 : i32
    %c0_i32_1 = arith.constant 0 : i32
    return %c0_i32, %c0_i32_0 : i32, i32
  }
  func.func @transform_2(%arg0: i32) -> i32 {
    %c0_i32 = arith.constant 0 : i32
    %c0_i32_0 = arith.constant 0 : i32
    return %c0_i32 : i32
  }
  func.func @transform_3(%arg0: i32) -> (i32, i32) {
    %c0_i32 = arith.constant 0 : i32
    %c0_i32_0 = arith.constant 0 : i32
    return %arg0, %c0_i32 : i32, i32
  }
}

</mosaic_0001>

<bundles_post_ra>
// kernel: net_forward.1
= control target key start
LH: loop header
LB: loop body
LE: loop exit
PB: predicated region body
PF: predicated region fallthrough
CT: control target
= control target key end

     0   :  { %s1030_s0 = inlined_call_operand.vmem [shape: f32[16,512], index: 0, kind: input, shape index: {}]   ;;  %s1031_s1 = inlined_call_operand.vmem [shape: f32[512,128], index: 1, kind: input, shape index: {}]   ;;  %s1032_s2 = inlined_call_operand.<no memory space> [shape: f32[1], index: 2, kind: input, shape index: {}]   ;;  %s1033_s3 = inlined_call_operand.hbm [shape: f32[16,128], index: 3, kind: output, shape index: {}]  }
   0x1   :  { %8 = sst [smem:[#allocation2]] %s1032_s2 }
   0x2   :  { %9 = vsyncpa [#allocation4], 0 }
   0x3   :  { %11 = vsyncpa [#allocation4 + $0x1], 0  ;;  %s727_s14 = smov 0   ;;  %s729_s15 = smov 0  }
   0x4   :  { %s731_s16 = smov 0   ;;  %s733_s17 = smov 0  }
   0x5 LB: > { %s748_s2 = sadd.s32 4294967295, %s701_s17   ;;  %s454_s18 = sadd.s32 4294967294, %s701_s17   ;;  %s701_s17 = sphi %s733_s17, %s1039_s17   ;;  %s697_s16 = sphi %s731_s16, %s1038_s16   ;;  %s693_s15 = sphi %s729_s15, %s1037_s15   ;;  %s689_s14 = sphi %s727_s14, %s1036_s14  }
   0x6   : > { %s752_s19 = sadd.s32 1, %s701_s17   ;;  %s92_s20 = sadd.s32 1, %s697_s16 }
   0x7   : > { %s89_s21 = ssub.s32 %s701_s17, %s752_s19  ;;  %p102_p0 = scmp.ne.s32.totalorder %s697_s16, %s693_s15 }
   0x8   : > { %p90_p1 = scmp.eq.s32.totalorder %s89_s21, 0  ;;  %p103_p2 = scmp.eq.s32.totalorder %s748_s2, 1 }
   0x9   : > { %p108_p3 = scmp.ne.s32.totalorder %s693_s15, %s689_s14  ;;  %p109_p4 = scmp.eq.s32.totalorder %s454_s18, 1 }
   0xa   : > { %s763_s22 = scalar_select %p90_p1, %s697_s16, %s92_s20  }
   0xb   : > { %p765_p5 = por %p103_p2, %p102_p0  ;;  %p769_p6 = por %p109_p4, %p108_p3 }
   0xc   : > { %p457_p7 = scmp.ge.s32.totalorder %s701_s17, 1  ;;  %p141_p8 = scmp.lt.s32.totalorder %s701_s17, 3 }
   0xe   : > { %p142_p9 = pnand %p457_p7, %p141_p8 }
   0xf   : > { %v190_v0 = vld [vmem:[%s1031_s1 + $0x80] sm:$0xff] (!%p142_p9)  ;;  %v191_v1 = vld [vmem:[%s1031_s1 + $0x88] sm:$0xff] (!%p142_p9)  ;;  %v192_v11 = vld [vmem:[%s1031_s1 + $0x90] sm:$0xff] (!%p142_p9)  ;;  %p165_p10 = scmp.lt.s32.totalorder (!%p142_p9), %s748_s2, 1  ;;  %s162_s27 = sand.u32 (!%p142_p9), 1, %s693_s15  }
  0x10   : > { %145 = sbr.rel (%p142_p9) target bundleno = 283 (0x11b), region = 32  ;;  %v174_v2 = vld [vmem:[%s1031_s1] sm:$0xff] (!%p142_p9)  ;;  %v536_v3 = vpack.c.bf16 (!%p142_p9), %v191_v1, %v190_v0  ;;  %v175_v4 = vld [vmem:[%s1031_s1 + $0x8] sm:$0xff] (!%p142_p9)  ;;  %v193_v13 = vld [vmem:[%s1031_s1 + $0x98] sm:$0xff] (!%p142_p9)  ;;  %s458_s28 = sshll.u32 (!%p142_p9), %s162_s27, 3 }
  0x11   : > { %v222_v5 = vld [vmem:[%s1031_s1 + $0x180] sm:$0xff] (!%p142_p9)  ;;  %v223_v6 = vld [vmem:[%s1031_s1 + $0x188] sm:$0xff] (!%p142_p9)  ;;  %v538_v7 = vpack.c.bf16 (!%p142_p9), %v175_v4, %v174_v2  ;;  %v176_v14 = vld [vmem:[%s1031_s1 + $0x10] sm:$0xff] (!%p142_p9)  ;;  %v540_v16 = vpack.c.bf16 (!%p142_p9), %v193_v13, %v192_v11  ;;  %s462_s29 = sshll.u32 (!%p142_p9), %s748_s2, 7  ;;  %s164_s30 = scalar_lea.vmem (!%p142_p9), [#allocation3], %s458_s28 }
  0x12   : > { %v568_v8 = vpack.c.bf16 (!%p142_p9), %v223_v6, %v222_v5  ;;  %v206_v9 = vld [vmem:[%s1031_s1 + $0x100] sm:$0xff] (!%p142_p9)  ;;  %v207_v10 = vld [vmem:[%s1031_s1 + $0x108] sm:$0xff] (!%p142_p9)  ;;  %537 = vmatprep.subr.bf16.mxu0 (!%p142_p9), %v536_v3  ;;  %v177_v15 = vld [vmem:[%s1031_s1 + $0x18] sm:$0xff] (!%p142_p9)  ;;  %s395_s4 = sshll.u32 (!%p142_p9), %s164_s30, 4  ;;  %s988_s6 = scalar_lea.hbm (!%p142_p9), %s1033_s3, %s462_s29  ;;  %s990_s4 = int_to_ptr.vmem [resolvable:$true] %s395_s4 }
  0x13   : > { %v570_v12 = vpack.c.bf16 (!%p142_p9), %v207_v10, %v206_v9  ;;  %539 = vmatpush3.bf16.msra.mxu0 (!%p142_p9), %v538_v7  ;;  %v542_v17 = vpack.c.bf16 (!%p142_p9), %v177_v15, %v176_v14  ;;  %v224_v18 = vld [vmem:[%s1031_s1 + $0x190] sm:$0xff] (!%p142_p9)  ;;  %v225_v19 = vld [vmem:[%s1031_s1 + $0x198] sm:$0xff] (!%p142_p9)  ;;  %v194_v23 = vld [vmem:[%s1031_s1 + $0xa0] sm:$0xff] (!%p142_p9)  ;;  %s382_s8 = scalar_lea.sflag (!%p142_p9), [#allocation4], %s162_s27  ;;  %s639_s10 = scalar_lea.vmem (!%p142_p9), %s990_s4, 128 }
  0x14   : > { %569 = vmatprep.subr.bf16.mxu1 (!%p142_p9), %v568_v8  ;;  %v208_v20 = vld [vmem:[%s1031_s1 + $0x110] sm:$0xff] (!%p142_p9)  ;;  %v572_v21 = vpack.c.bf16 (!%p142_p9), %v225_v19, %v224_v18  ;;  %v209_v22 = vld [vmem:[%s1031_s1 + $0x118] sm:$0xff] (!%p142_p9)  ;;  %v195_v24 = vld [vmem:[%s1031_s1 + $0xa8] sm:$0xff] (!%p142_p9)  ;;  %541 = vmatprep.subr.bf16.mxu0 (!%p142_p9), %v540_v16  ;;  %p640_p11 = scmp.ne.s32.totalorder (!%p142_p9), %s990_s4, %s639_s10 }
  0x15   : > { %571 = vmatpush3.bf16.msra.mxu1 (!%p142_p9), %v570_v12  ;;  %v574_v25 = vpack.c.bf16 (!%p142_p9), %v209_v22, %v208_v20  ;;  %v544_v26 = vpack.c.bf16 (!%p142_p9), %v195_v24, %v194_v23  ;;  %v178_v27 = vld [vmem:[%s1031_s1 + $0x20] sm:$0xff] (!%p142_p9)  ;;  %v179_v28 = vld [vmem:[%s1031_s1 + $0x28] sm:$0xff] (!%p142_p9)  ;;  %v196_v35 = vld [vmem:[%s1031_s1 + $0xb0] sm:$0xff] (!%p142_p9) }
  0x16   : > { %v226_v29 = vld [vmem:[%s1031_s1 + $0x1a0] sm:$0xff] (!%p142_p9)  ;;  %573 = vmatprep.subr.bf16.mxu1 (!%p142_p9), %v572_v21  ;;  %v227_v30 = vld [vmem:[%s1031_s1 + $0x1a8] sm:$0xff] (!%p142_p9)  ;;  %v546_v33 = vpack.c.bf16 (!%p142_p9), %v179_v28, %v178_v27  ;;  %v197_v36 = vld [vmem:[%s1031_s1 + $0xb8] sm:$0xff] (!%p142_p9)  ;;  %p641_p12 = pnand (!%p142_p9), %p640_p11, %p765_p5 }
  0x17   : > { %v210_v31 = vld [vmem:[%s1031_s1 + $0x120] sm:$0xff]  ;;  %v211_v32 = vld [vmem:[%s1031_s1 + $0x128] sm:$0xff]  ;;  %543 = vmatpush3.bf16.msra.mxu0 %v542_v17  ;;  %v576_v34 = vpack.c.bf16 %v227_v30, %v226_v29  ;;  %v180_v37 = vld [vmem:[%s1031_s1 + $0x30] sm:$0xff]  ;;  %v548_v39 = vpack.c.bf16 %v197_v36, %v196_v35  ;;  %s881_s9 = scalar_select %p165_p10, %s748_s2, 1 }
  0x18   : > { %545 = vmatprep.subr.bf16.mxu0 %v544_v26  ;;  %v578_v38 = vpack.c.bf16 %v211_v32, %v210_v31  ;;  %v181_v40 = vld [vmem:[%s1031_s1 + $0x38] sm:$0xff]  ;;  %v228_v41 = vld [vmem:[%s1031_s1 + $0x1b0] sm:$0xff]  ;;  %v198_v46 = vld [vmem:[%s1031_s1 + $0xc0] sm:$0xff]  ;;  %p642_p13 = pneg %p641_p12  ;;  %s703_s2 = smov [#allocation3]  }
  0x19   : > { %575 = vmatpush3.bf16.msra.mxu1 %v574_v25  ;;  %v229_v42 = vld [vmem:[%s1031_s1 + $0x1b8] sm:$0xff]  ;;  %v212_v44 = vld [vmem:[%s1031_s1 + $0x130] sm:$0xff]  ;;  %v199_v47 = vld [vmem:[%s1031_s1 + $0xc8] sm:$0xff]  ;;  %v550_v48 = vpack.c.bf16 %v181_v40, %v180_v37  ;;  %s465_s12 = sshll.u32 %s881_s9, 5  ;;  %s238_s9 = sld [smem:[#allocation2]] }
  0x1a   : > { %577 = vmatprep.subr.bf16.mxu1 %v576_v34  ;;  %v580_v43 = vpack.c.bf16 %v229_v42, %v228_v41  ;;  %v213_v45 = vld [vmem:[%s1031_s1 + $0x138] sm:$0xff]  ;;  %v230_v49 = vld [vmem:[%s1031_s1 + $0x1c0] sm:$0xff]  ;;  %v231_v50 = vld [vmem:[%s1031_s1 + $0x1c8] sm:$0xff]  ;;  %v552_v52 = vpack.c.bf16 %v199_v47, %v198_v46  ;;  %s935_s7 = scalar_lea.vmem %s1030_s0, %s465_s12  ;;  %s643_s11 = sshll.u32 %s703_s2, 4  ;;  %s644_s11 = int_to_ptr.vmem [resolvable:$false] %s643_s11 }
  0x1b   : > { %547 = vmatpush3.bf16.msra.mxu0 %v546_v33  ;;  %v582_v51 = vpack.c.bf16 %v213_v45, %v212_v44  ;;  %v182_v53 = vld [vmem:[%s1031_s1 + $0x40] sm:$0xff]  ;;  %v183_v54 = vld [vmem:[%s1031_s1 + $0x48] sm:$0xff]  ;;  %v584_v56 = vpack.c.bf16 %v231_v50, %v230_v49  ;;  %v200_v58 = vld [vmem:[%s1031_s1 + $0xd0] sm:$0xff]  ;;  %s645_s13 = scalar_lea.vmem %s644_s11, 256  ;;  %p646_p0 = scmp.lt.s32.totalorder %s990_s4, %s644_s11 }
  0x1c   : > { %549 = vmatprep.subr.bf16.mxu0 %v548_v39  ;;  %v214_v55 = vld [vmem:[%s1031_s1 + $0x140] sm:$0xff]  ;;  %v215_v57 = vld [vmem:[%s1031_s1 + $0x148] sm:$0xff]  ;;  %v201_v59 = vld [vmem:[%s1031_s1 + $0xd8] sm:$0xff]  ;;  %v554_v62 = vpack.c.bf16 %v183_v54, %v182_v53  ;;  %p647_p1 = scmp.lt.s32.totalorder %s645_s13, %s639_s10 }
  0x1d   : > { %579 = vmatpush3.bf16.msra.mxu1 %v578_v38  ;;  %v232_v60 = vld [vmem:[%s1031_s1 + $0x1d0] sm:$0xff]  ;;  %v233_v61 = vld [vmem:[%s1031_s1 + $0x1d8] sm:$0xff]  ;;  %v586_v63 = vpack.c.bf16 %v215_v57, %v214_v55  ;;  %v556_v0 = vpack.c.bf16 %v201_v59, %v200_v58  ;;  %v202_v6 = vld [vmem:[%s1031_s1 + $0xe0] sm:$0xff] }
  0x1e   : > { %581 = vmatprep.subr.bf16.mxu1 %v580_v43  ;;  %v184_v1 = vld [vmem:[%s1031_s1 + $0x50] sm:$0xff]  ;;  %v185_v2 = vld [vmem:[%s1031_s1 + $0x58] sm:$0xff]  ;;  %v588_v4 = vpack.c.bf16 %v233_v61, %v232_v60  ;;  %v203_v7 = vld [vmem:[%s1031_s1 + $0xe8] sm:$0xff]  ;;  %p648_p2 = por %p647_p1, %p646_p0 }
  0x1f   : > { %551 = vmatpush3.bf16.msra.mxu0 %v550_v48  ;;  %v216_v3 = vld [vmem:[%s1031_s1 + $0x150] sm:$0xff]  ;;  %v217_v5 = vld [vmem:[%s1031_s1 + $0x158] sm:$0xff]  ;;  %v234_v8 = vld [vmem:[%s1031_s1 + $0x1e0] sm:$0xff]  ;;  %v558_v10 = vpack.c.bf16 %v185_v2, %v184_v1  ;;  %v560_v14 = vpack.c.bf16 %v203_v7, %v202_v6  ;;  %v239_v37 = vstv %s238_s9 }
  0x20   : > { %553 = vmatprep.subr.bf16.mxu0 %v552_v52  ;;  %v235_v9 = vld [vmem:[%s1031_s1 + $0x1e8] sm:$0xff]  ;;  %v186_v11 = vld [vmem:[%s1031_s1 + $0x60] sm:$0xff]  ;;  %v590_v13 = vpack.c.bf16 %v217_v5, %v216_v3  ;;  %v204_v19 = vld [vmem:[%s1031_s1 + $0xf0] sm:$0xff]  ;;  %p649_p3 = pnand %p648_p2, %p642_p13 }
  0x21   : > { %583 = vmatpush3.bf16.msra.mxu1 %v582_v51  ;;  %v187_v12 = vld [vmem:[%s1031_s1 + $0x68] sm:$0xff]  ;;  %v218_v15 = vld [vmem:[%s1031_s1 + $0x160] sm:$0xff]  ;;  %v592_v18 = vpack.c.bf16 %v235_v9, %v234_v8  ;;  %v205_v20 = vld [vmem:[%s1031_s1 + $0xf8] sm:$0xff] }
  0x22   : > { %585 = vmatprep.subr.bf16.mxu1 %v584_v56  ;;  %v219_v16 = vld [vmem:[%s1031_s1 + $0x168] sm:$0xff]  ;;  %v173_v21 = vld [vmem:[%s935_s7 + $0x18] sm:$0xff]  ;;  %v236_v22 = vld [vmem:[%s1031_s1 + $0x1f0] sm:$0xff]  ;;  %v562_v24 = vpack.c.bf16 %v187_v12, %v186_v11  ;;  %v564_v26 = vpack.c.bf16 %v205_v20, %v204_v19 }
  0x23   : > { %555 = vmatpush3.bf16.msra.mxu0 %v554_v62  ;;  %v171_v17 = vld [vmem:[%s935_s7 + $0x8] sm:$0xff]  ;;  %v237_v23 = vld [vmem:[%s1031_s1 + $0x1f8] sm:$0xff]  ;;  %374 = vmatprep.mubr.f32.mxu1 %v173_v21  ;;  %v594_v25 = vpack.c.bf16 %v219_v16, %v218_v15  ;;  %v188_v27 = vld [vmem:[%s1031_s1 + $0x70] sm:$0xff] }
  0x24   : > { %557 = vmatprep.subr.bf16.mxu0 %v556_v0  ;;  %304 = vmatprep.mubr.f32.mxu0 %v171_v17  ;;  %v189_v28 = vld [vmem:[%s1031_s1 + $0x78] sm:$0xff]  ;;  %v596_v29 = vpack.c.bf16 %v237_v23, %v236_v22  ;;  %v220_v30 = vld [vmem:[%s1031_s1 + $0x170] sm:$0xff]  ;;  %v170_v34 = vld [vmem:[%s935_s7] sm:$0xff] }
  0x25   : > { %587 = vmatpush3.bf16.msra.mxu1 %v586_v63  ;;  %v221_v31 = vld [vmem:[%s1031_s1 + $0x178] sm:$0xff]  ;;  %v566_v32 = vpack.c.bf16 %v189_v28, %v188_v27  ;;  %v172_v35 = vld [vmem:[%s935_s7 + $0x10] sm:$0xff] }
  0x26   : > { %589 = vmatprep.subr.bf16.mxu1 %v588_v4  ;;  %v598_v33 = vpack.c.bf16 %v221_v31, %v220_v30 }
  0x27   : > { %559 = vmatpush3.bf16.msra.mxu0 %v558_v10 }
  0x28   : > { %561 = vmatprep.subr.bf16.mxu0 %v560_v14 }
  0x29   : > { %591 = vmatpush3.bf16.msra.mxu1 %v590_v13 }
  0x2a   : > { %593 = vmatprep.subr.bf16.mxu1 %v592_v18 }
  0x2b   : > { %563 = vmatpush3.bf16.msra.mxu0 %v562_v24 }
  0x2c   : > { %565 = vmatprep.subr.bf16.mxu0 %v564_v26 }
  0x2d   : > { %595 = vmatpush3.bf16.msra.mxu1 %v594_v25 }
  0x2e   : > { %597 = vmatprep.subr.bf16.mxu1 %v596_v29 }
  0x2f   : > { %567 = vmatpush3.bf16.msra.mxu0 %v566_v32 }
  0x31   : > { %599 = vmatpush3.bf16.msra.mxu1 %v598_v33 }
  0x32   : > { %305 = vmatmul.mubr.f32.vlgmr.msra.gmra.mrb[0].mxu0 %v170_v34 }
  0x34   : > { %375 = vmatmul.mubr.f32.vlgmr.msra.gmra.mrb[0].mxu1 %v172_v35 }
 0x105   : > { %v498_v36 = vpop.f32.mrb[0].mxu0 }
 0x106   : > { %v499_v38 = vpop.f32.mrb[1].mxu0 }
 0x107   : > { %v533_v39 = vpop.f32.mrb[0].mxu1  ;;  %v500_v40 = vadd.f32 %v499_v38, %v498_v36 }
 0x108   : > { %v534_v41 = vpop.f32.mrb[1].mxu1 }
 0x109   : > { %v535_v42 = vadd.f32 %v534_v41, %v533_v39  ;;  %v307_v43 = vadd.f32 %v500_v40, %v239_v37 }
 0x10b   : > { %v377_v44 = vadd.f32 %v535_v42, %v307_v43 }
 0x10d   : > { %380 = vst [vmem:[%s164_s30] sm:$0xff] %v377_v44 }
 0x10e   : > { %652 = shalt.err (!%p649_p3)
}
 0x10f   : > { %s653_s18 = scalar_lea.hbm %s988_s6, 128  ;;  %s657_s25 = scalar_lea.hbm %s1033_s3, 256 }
 0x110   : > { %p654_p4 = scmp.ne.s32.totalorder %s988_s6, %s653_s18  ;;  %p658_p9 = scmp.lt.u32.totalorder %s988_s6, %s1033_s3 }
 0x111   : > { %p659_p10 = scmp.lt.u32.totalorder %s657_s25, %s653_s18  ;;  %p661_p12 = scmp.lt.u32.totalorder %s653_s18, %s988_s6 }
 0x112   : > { %p655_p7 = pnand %p654_p4, %p765_p5 }
 0x113   : > { %p660_p11 = por %p659_p10, %p658_p9 }
 0x114   : > { %p656_p8 = pneg %p655_p7 }
 0x115   : > { %p662_p13 = por %p661_p12, %p660_p11 }
 0x117   : > { %p663_p0 = pnand %p662_p13, %p656_p8 }
 0x119   : > { %666 = shalt.err (!%p663_p0)
}
 0x11a   : > { %600 = dma.vmem_to_hbm [thread:$0]  (%p765_p5), %s990_s4, 128, %s988_s6, %s382_s8  }
 0x11b PF: > { %p606_p1 = scmp.ge.s32.totalorder %s701_s17, 2  ;;  %s407_s9 = sand.u32 1, %s689_s14  }
 0x11c   : > { %s408_s27 = scalar_lea.sflag [#allocation4], %s407_s9 }
 0x11d   : > { %p603_p2 = pnand %p606_p1, %p769_p6 }
 0x11f   : > { %684 = dma.done.wait (!%p603_p2), %s408_s27, 128  }
 0x120   : > { %686 = vsyncadd (!%p603_p2), %s408_s27, 4294967168  ;;  %p14_p3 = scmp.ge.s32.totalorder %s752_s19, 4   ;;  %s1036_s14 = smov %s693_s15 }
 0x121   : > { %s1037_s15 = smov %s697_s16  ;;  %s1038_s16 = smov %s763_s22 }
 0x122   : > { %s1039_s17 = smov %s752_s19  ;;  %16 = sbr.rel (!%p14_p3) target bundleno = 5 (0x5), region = 67 }
 0x129   :  { %413 = vsyncpa [#allocation4], 1 }
 0x12a   :  { %415 = vsyncpa [#allocation4 + $0x1], 1 }

</bundles_post_ra>
